<compile_context>
chip_gen: v7x
topology: tpu7x:2x2x1
jax: 0.10.0
libtpu: 0.0.40
codegen_flags: <defaults>
</compile_context>

<pallas_src>
import functools
import math

import jax
import jax.numpy as jnp
from jax import lax
from jax.experimental import pallas as pl
from jax.experimental.pallas import tpu as pltpu

_LANES = 128
_SUBLANES = 8
_NCORES = 2   # split rows across 2 TensorCores (v7x); no-op on 1-TC chips


def _sublane_multiple(dtype):
    # sublane packing: f32 -> 8, bf16/f16 -> 16, int8/fp8 -> 32
    return _SUBLANES * max(1, 4 // jnp.dtype(dtype).itemsize)


def _block_bytes_per_input():
    # 2 MiB/input/buffer fits v5e's 16 MiB scoped-VMEM default
    # (2 inputs x 2 pipeline buffers = 8 MiB); v6e/v7x have room for 4 MiB.
    try:
        kind = jax.devices()[0].device_kind.lower()
    except Exception:
        return 2 * 1024 * 1024
    if ("v6" in kind) or ("v7" in kind):
        return 4 * 1024 * 1024
    return 2 * 1024 * 1024


def _l1_partial_kernel(x_ref, y_ref, o_ref, *, tm, rows, steps, need_mask):
    c = pl.program_id(0)   # TensorCore-split axis ("parallel")
    i = pl.program_id(1)   # streaming / reduction axis ("arbitrary")

    @pl.when(i == 0)
    def _init():
        o_ref[...] = jnp.zeros_like(o_ref)

    d = jnp.abs(x_ref[...].astype(jnp.float32) - y_ref[...].astype(jnp.float32))

    if need_mask:
        # The last tile is ragged (Pallas pads input edge blocks with
        # undefined data) and/or a clamped duplicate of the final block:
        # zero out any rows at or beyond the true row count.
        blk = c * steps + i
        row_ids = blk * tm + lax.broadcasted_iota(jnp.int32, (tm, _LANES), 0)
        d = jnp.where(row_ids < rows, d, 0.0)

    # (tm,128) -> (tm//8, 8, 128): trailing dims match the (8,128) vreg tile so
    # the reshape is free; the axis-0 sum is pure VALU adds (no per-step XLU
    # cross-sublane reduce).  Accumulate into the VMEM-resident output block.
    o_ref[...] += d.reshape(tm // _SUBLANES, _SUBLANES, _LANES).sum(axis=0)[None]


def l1_loss(imgs, gts):
    assert imgs.shape == gts.shape, "L1Loss requires matching shapes"
    total = math.prod(imgs.shape)

    # TPU Pallas has no 64-bit path; narrow (torch default is f32 anyway).
    def _narrow(a):
        return a.astype(jnp.float32) if jnp.dtype(a.dtype).itemsize > 4 else a

    imgs = _narrow(imgs)
    gts = _narrow(gts)

    itemsize = max(jnp.dtype(imgs.dtype).itemsize, jnp.dtype(gts.dtype).itemsize)
    sub = max(_sublane_multiple(imgs.dtype), _sublane_multiple(gts.dtype))

    # Lane-dense (rows, 128) view.  On the common aligned path this is a free,
    # layout-preserving reshape of the native-dtype input (no extra HBM pass).
    if total % _LANES == 0:
        rows = total // _LANES

        def _as2d(a):
            return a.reshape(rows, _LANES)
    else:
        # TODO(synk): misaligned element count; this rare fallback pays one
        # extra HBM copy per input (zeros in BOTH inputs -> |0-0| = 0).
        rows = pl.cdiv(total, _LANES)
        pad = rows * _LANES - total

        def _as2d(a):
            return jnp.pad(a.reshape(-1), (0, pad)).reshape(rows, _LANES)

    x2 = _as2d(imgs)
    y2 = _as2d(gts)

    # Row tile: big streaming blocks, capped at 8192 rows, rounded to the
    # sublane-packing multiple so sub-32-bit dtypes stay legal.
    max_tm = min(8192, _block_bytes_per_input() // (_LANES * itemsize))
    max_tm = max(sub, (max_tm // sub) * sub)
    tm = min(max_tm, ((rows + sub - 1) // sub) * sub)
    nblocks = pl.cdiv(rows, tm)
    ncores = min(_NCORES, nblocks)
    steps = pl.cdiv(nblocks, ncores)
    need_mask = (ncores * steps * tm) != rows

    def _in_map(c, i):
        # Clamp so a possible trailing duplicate block stays in bounds; its
        # contribution is zeroed by the in-kernel row mask.
        return (jnp.minimum(c * steps + i, nblocks - 1), 0)

    partials = pl.pallas_call(
        functools.partial(_l1_partial_kernel, tm=tm, rows=rows, steps=steps,
                          need_mask=need_mask),
        out_shape=jax.ShapeDtypeStruct((ncores, _SUBLANES, _LANES), jnp.float32),
        grid_spec=pltpu.PrefetchScalarGridSpec(
            num_scalar_prefetch=0,
            grid=(ncores, steps),
            in_specs=[pl.BlockSpec((tm, _LANES), _in_map),
                      pl.BlockSpec((tm, _LANES), _in_map)],
            out_specs=pl.BlockSpec((1, _SUBLANES, _LANES),
                                   lambda c, i: (c, 0, 0)),
        ),
        compiler_params=pltpu.CompilerParams(
            dimension_semantics=("parallel", "arbitrary"),
            vmem_limit_bytes=32 * 1024 * 1024),
    )(x2, y2)

    # Tiny (ncores*8*128) final reduce + 1/count scale in plain JAX.
    return jnp.sum(partials) * (1.0 / float(total))


if __name__ == "__main__":
    key = jax.random.PRNGKey(0)
    k_img, k_gt = jax.random.split(key)
    shape = (2, 4, 16, 16)
    imgs = jax.random.uniform(k_img, shape, jnp.float32, minval=-1.0, maxval=1.0)
    gts = jax.random.uniform(k_gt, shape, jnp.float32, minval=-1.0, maxval=1.0)

    loss = jax.jit(l1_loss)(imgs, gts)
    jax.block_until_ready(loss)

    ref = jnp.mean(jnp.abs(imgs - gts))
    assert loss.shape == () and bool(jnp.isfinite(loss))
    assert jnp.allclose(loss, ref, rtol=1e-5, atol=1e-6)
    print("KERNEL_OK")
</pallas_src>

<mosaic_0001>
module attributes {stable_mosaic.version = 11 : i64} {
  func.func @_l1_partial_kernel(%arg0: i32, %arg1: i32, %arg2: memref<16x128xf32, #tpu.memory_space<vmem>>, %arg3: memref<16x128xf32, #tpu.memory_space<vmem>>, %arg4: memref<1x8x128xf32, #tpu.memory_space<vmem>>) attributes {dimension_semantics = [#tpu.dimension_semantics<parallel>, #tpu.dimension_semantics<arbitrary>], iteration_bounds = array<i64: 1, 1>, scalar_prefetch = 0 : i64, scratch_operands = 0 : i64, tpu.core_type = #tpu.core_type<tc>, window_params = [{transform_indices = @transform_0, window_bounds = array<i64: 16, 128>}, {transform_indices = @transform_1, window_bounds = array<i64: 16, 128>}, {transform_indices = @transform_2, window_bounds = array<i64: 1, 8, 128>}]} {
    %c0_i32 = arith.constant 0 : i32
    %0 = arith.cmpi eq, %arg1, %c0_i32 : i32
    %1 = arith.extui %0 : i1 to i32
    %c0_i32_0 = arith.constant 0 : i32
    %2 = arith.cmpi ne, %1, %c0_i32_0 : i32
    scf.if %2 {
      %cst_10 = arith.constant 0.000000e+00 : f32
      %13 = vector.broadcast %cst_10 : f32 to vector<1x8x128xf32>
      %c0_11 = arith.constant 0 : index
      %c0_12 = arith.constant 0 : index
      %c0_13 = arith.constant 0 : index
      %14 = vector.load %arg4[%c0_11, %c0_12, %c0_13] : memref<1x8x128xf32, #tpu.memory_space<vmem>>, vector<1x8x128xf32>
      tpu.vector_store %arg4[%c0_11, %c0_12, %c0_13], %13 {strides = array<i32>} : memref<1x8x128xf32, #tpu.memory_space<vmem>>, vector<1x8x128xf32>,
    } else {
    }
    %c0 = arith.constant 0 : index
    %c0_1 = arith.constant 0 : index
    %3 = vector.load %arg2[%c0, %c0_1] : memref<16x128xf32, #tpu.memory_space<vmem>>, vector<16x128xf32>
    %c0_2 = arith.constant 0 : index
    %c0_3 = arith.constant 0 : index
    %4 = vector.load %arg3[%c0_2, %c0_3] : memref<16x128xf32, #tpu.memory_space<vmem>>, vector<16x128xf32>
    %5 = arith.subf %3, %4 : vector<16x128xf32>
    %6 = math.absf %5 : vector<16x128xf32>
    %c0_4 = arith.constant 0 : index
    %c0_5 = arith.constant 0 : index
    %c0_6 = arith.constant 0 : index
    %7 = vector.load %arg4[%c0_4, %c0_5, %c0_6] : memref<1x8x128xf32, #tpu.memory_space<vmem>>, vector<1x8x128xf32>
    %8 = vector.shape_cast %6 : vector<16x128xf32> to vector<2x8x128xf32>
    %cst = arith.constant dense<0.000000e+00> : vector<8x128xf32>
    %9 = vector.multi_reduction <add>, %8, %cst [0] : vector<2x8x128xf32> to vector<8x128xf32>
    %10 = vector.shape_cast %9 : vector<8x128xf32> to vector<1x8x128xf32>
    %11 = arith.addf %7, %10 : vector<1x8x128xf32>
    %c0_7 = arith.constant 0 : index
    %c0_8 = arith.constant 0 : index
    %c0_9 = arith.constant 0 : index
    %12 = vector.load %arg4[%c0_7, %c0_8, %c0_9] : memref<1x8x128xf32, #tpu.memory_space<vmem>>, vector<1x8x128xf32>
    tpu.vector_store %arg4[%c0_7, %c0_8, %c0_9], %11 {strides = array<i32>} : memref<1x8x128xf32, #tpu.memory_space<vmem>>, vector<1x8x128xf32>,
    return
  }
  func.func @transform_0(%arg0: i32, %arg1: i32) -> (i32, i32) {
    %c1_i32 = arith.constant 1 : i32
    %0 = arith.muli %arg0, %c1_i32 : i32
    %1 = arith.addi %0, %arg1 : i32
    %c0_i32 = arith.constant 0 : i32
    %2 = arith.minsi %1, %c0_i32 : i32
    %c0_i32_0 = arith.constant 0 : i32
    %c0_i32_1 = arith.constant 0 : i32
    return %2, %c0_i32_0 : i32, i32
  }
  func.func @transform_1(%arg0: i32, %arg1: i32) -> (i32, i32) {
    %c1_i32 = arith.constant 1 : i32
    %0 = arith.muli %arg0, %c1_i32 : i32
    %1 = arith.addi %0, %arg1 : i32
    %c0_i32 = arith.constant 0 : i32
    %2 = arith.minsi %1, %c0_i32 : i32
    %c0_i32_0 = arith.constant 0 : i32
    %c0_i32_1 = arith.constant 0 : i32
    return %2, %c0_i32_0 : i32, i32
  }
  func.func @transform_2(%arg0: i32, %arg1: i32) -> (i32, i32, i32) {
    %c0_i32 = arith.constant 0 : i32
    %c0_i32_0 = arith.constant 0 : i32
    %c0_i32_1 = arith.constant 0 : i32
    return %arg0, %c0_i32, %c0_i32_0 : i32, i32, i32
  }
}

</mosaic_0001>

<bundles_post_ra>
// kernel: l1_loss.1
= control target key start
LH: loop header
LB: loop body
LE: loop exit
PB: predicated region body
PF: predicated region fallthrough
CT: control target
= control target key end

     0   :  { %s139_s0 = inlined_call_operand.vmem [shape: f32[16,128], index: 0, kind: input, shape index: {}]   ;;  %s140_s1 = inlined_call_operand.vmem [shape: f32[16,128], index: 1, kind: input, shape index: {}]   ;;  %s141_s2 = inlined_call_operand.vmem [shape: f32[1,8,128], index: 2, kind: output, shape index: {}]  }
   0x1   :  { %v80_v0 = vld [vmem:[%s139_s0] sm:$0xff]  ;;  %v81_v1 = vld [vmem:[%s139_s0 + $0x8] sm:$0xff] }
   0x2   :  { %v82_v2 = vld [vmem:[%s140_s1] sm:$0xff]  ;;  %v83_v3 = vld [vmem:[%s140_s1 + $0x8] sm:$0xff] }
   0x3   :  { %v84_v4 = vsub.f32 %v80_v0, %v82_v2  ;;  %v85_v5 = vsub.f32 %v81_v1, %v83_v3 }
   0x5   :  { %v86_v6 = vand.u32 2147483647, %v84_v4  ;;  %v87_v7 = vand.u32 2147483647, %v85_v5 }
   0x7   :  { %v89_v8 = vadd.f32 %v87_v7, %v86_v6 }
   0x9   :  { %91 = vst [vmem:[%s141_s2] sm:$0xff] %v89_v8 }

</bundles_post_ra>
